<compile_context>
chip_gen: v5e
topology: v5e:2x2
jax: 0.10.0
libtpu: 0.0.40
codegen_flags: <defaults>
</compile_context>

<pallas_src>
import numpy as np
import jax
import jax.numpy as jnp
from jax.experimental import pallas as pl
from jax.experimental.pallas import tpu as pltpu


def _build_pe(max_length: int, embedding_dim: int) -> jnp.ndarray:
    """Deterministic sinusoidal positional-encoding buffer (plain JAX glue)."""
    position = jnp.arange(0, max_length, dtype=jnp.float32)[:, None]          # (L, 1)
    div_term = jnp.exp(
        jnp.arange(0, embedding_dim, 2, dtype=jnp.float32)
        * (-jnp.log(jnp.float32(10000.0)) / embedding_dim)
    )                                                                          # (D/2,)
    pe = jnp.zeros((max_length, embedding_dim), dtype=jnp.float32)
    pe = pe.at[:, 0::2].set(jnp.sin(position * div_term))
    pe = pe.at[:, 1::2].set(jnp.cos(position * div_term))
    # unsqueeze(0).transpose(0, 1) -> (max_length, 1, embedding_dim)
    return pe[:, None, :]


def _add_pe_kernel(x_ref, pe_ref, o_ref):
    # One elementwise broadcast add; same body serves both layouts:
    #   3-D path: (Sb, B, D) + (Sb, 1, D)   (broadcast over batch/sublane axis)
    #   2-D path: (Sb, B*D) + (Sb, B*D)
    o_ref[...] = (x_ref[...] + pe_ref[...]).astype(o_ref.dtype)


_TARGET_BLOCK_BYTES = 2 * 1024 * 1024   # ~2 MiB x/out tiles: big enough to reach
                                        # ~85% of HBM roofline, small enough that
                                        # 2*(x + pe + out) double-buffered stays
                                        # well under every generation's scoped VMEM.
_VMEM_LIMIT_BYTES = 32 * 1024 * 1024    # explicit scoped-VMEM limit, safe on
                                        # v5e/v6e (128 MiB phys) and v7x (64 MiB phys).


def _choose_block_rows(S: int, row_bytes: int, block_rows) -> int:
    if block_rows is not None:
        sb = min(int(block_rows), S)
    else:
        sb = min(S, max(1, _TARGET_BLOCK_BYTES // max(1, row_bytes)))
    if sb < S:
        sb = max(8, (sb // 8) * 8)   # multiple of 8 -> dense sublane tiles
        sb = min(sb, S)
    return sb


def fixed_positional_encoding(x: jnp.ndarray, pe: jnp.ndarray, *, block_rows=None) -> jnp.ndarray:
    """x: (S, B, D); pe: (max_length, 1, D). Returns x + pe[:S] (broadcast over B)."""
    S, B, D = x.shape
    pe_slice = pe[:S]                              # mirrors pe[:x.size(0), :]
    itemsize = jnp.dtype(x.dtype).itemsize
    row_bytes = B * D * itemsize

    lane_dense_3d = (D % 128 == 0)
    if lane_dense_3d:
        # D already a multiple of 128 -> keep (S, B, D); each (Sb, B, D) block is
        # a contiguous HBM slab and the last dim is lane-dense.
        x_in, pe_in = x, pe_slice                                   # pe: (S, 1, D)
        sb = _choose_block_rows(S, row_bytes, block_rows)
        grid = (pl.cdiv(S, sb),)
        in_specs = [
            pl.BlockSpec((sb, B, D), lambda i: (i, 0, 0)),          # x tile
            pl.BlockSpec((sb, 1, D), lambda i: (i, 0, 0)),          # pe tile (1/B of x traffic)
        ]
        out_specs = pl.BlockSpec((sb, B, D), lambda i: (i, 0, 0))
        out_shape = jax.ShapeDtypeStruct((S, B, D), x.dtype)
    else:
        # D < 128 (or not a multiple of 128): fold (B, D) into one lane axis so
        # vregs/stores are dense instead of masked partial stores.
        x_in = x.reshape(S, B * D)
        pe_in = jnp.broadcast_to(pe_slice, (S, B, D)).reshape(S, B * D)
        sb = _choose_block_rows(S, row_bytes, block_rows)
        grid = (pl.cdiv(S, sb),)
        in_specs = [
            pl.BlockSpec((sb, B * D), lambda i: (i, 0)),
            pl.BlockSpec((sb, B * D), lambda i: (i, 0)),
        ]
        out_specs = pl.BlockSpec((sb, B * D), lambda i: (i, 0))
        out_shape = jax.ShapeDtypeStruct((S, B * D), x.dtype)

    x_bytes = S * B * D * itemsize
    pe_bytes = pe_in.size * jnp.dtype(pe_in.dtype).itemsize
    cost = pl.CostEstimate(
        flops=S * B * D,                 # one add per element
        transcendentals=0,
        bytes_accessed=2 * x_bytes + pe_bytes,   # read x + pe, write out
    )

    out = pl.pallas_call(
        _add_pe_kernel,
        out_shape=out_shape,
        grid_spec=pltpu.PrefetchScalarGridSpec(
            num_scalar_prefetch=0,
            grid=grid,
            in_specs=in_specs,
            out_specs=out_specs,
        ),
        compiler_params=pltpu.CompilerParams(
            dimension_semantics=("parallel",),   # disjoint output blocks -> megacore-shardable
            vmem_limit_bytes=_VMEM_LIMIT_BYTES,
        ),
        cost_estimate=cost,
        input_output_aliases={0: 0},             # output reuses x's HBM buffer when x is dead
    )(x_in, pe_in)

    if not lane_dense_3d:
        out = out.reshape(S, B, D)
    return out


if __name__ == "__main__":
    # Module-default embedding_dim / max_length, small seq & batch.
    SEQ, BATCH, EMBED_DIM, MAX_LEN = 64, 2, 256, 1024

    key = jax.random.PRNGKey(0)
    x = jax.random.normal(key, (SEQ, BATCH, EMBED_DIM), dtype=jnp.float32)
    pe = _build_pe(MAX_LEN, EMBED_DIM)

    # Plain-JAX reference of the PyTorch forward (computed before the aliased call).
    ref = x + pe[:SEQ]

    # block_rows=16 -> grid of 4 pipelined steps (exercises the tiled path).
    out = fixed_positional_encoding(x, pe, block_rows=16)
    out = jax.block_until_ready(out)
    np.testing.assert_allclose(np.asarray(out), np.asarray(ref), rtol=1e-6, atol=1e-6)

    # Also exercise the lane-dense 2-D fallback path (D not a multiple of 128).
    SEQ2, D2 = 16, 32
    x2 = jax.random.normal(jax.random.PRNGKey(1), (SEQ2, BATCH, D2), dtype=jnp.float32)
    pe2 = _build_pe(64, D2)
    ref2 = x2 + pe2[:SEQ2]
    out2 = jax.block_until_ready(fixed_positional_encoding(x2, pe2))
    np.testing.assert_allclose(np.asarray(out2), np.asarray(ref2), rtol=1e-6, atol=1e-6)

    print("KERNEL_OK")
</pallas_src>

<mosaic_0001>
module attributes {stable_mosaic.version = 11 : i64} {
  func.func @_add_pe_kernel(%arg0: i32, %arg1: memref<16x2x256xf32, #tpu.memory_space<vmem>>, %arg2: memref<16x1x256xf32, #tpu.memory_space<vmem>>, %arg3: memref<16x2x256xf32, #tpu.memory_space<vmem>>) attributes {dimension_semantics = [#tpu.dimension_semantics<parallel>], iteration_bounds = array<i64: 4>, scalar_prefetch = 0 : i64, scratch_operands = 0 : i64, tpu.core_type = #tpu.core_type<tc>, window_params = [{transform_indices = @transform_0, window_bounds = array<i64: 16, 2, 256>}, {transform_indices = @transform_1, window_bounds = array<i64: 16, 1, 256>}, {transform_indices = @transform_2, window_bounds = array<i64: 16, 2, 256>}]} {
    %c0 = arith.constant 0 : index
    %c0_0 = arith.constant 0 : index
    %c0_1 = arith.constant 0 : index
    %0 = vector.load %arg1[%c0, %c0_0, %c0_1] : memref<16x2x256xf32, #tpu.memory_space<vmem>>, vector<16x2x256xf32>
    %c0_2 = arith.constant 0 : index
    %c0_3 = arith.constant 0 : index
    %c0_4 = arith.constant 0 : index
    %1 = vector.load %arg2[%c0_2, %c0_3, %c0_4] : memref<16x1x256xf32, #tpu.memory_space<vmem>>, vector<16x1x256xf32>
    %2 = vector.broadcast %1 : vector<16x1x256xf32> to vector<16x2x256xf32>
    %3 = arith.addf %0, %2 : vector<16x2x256xf32>
    %c0_5 = arith.constant 0 : index
    %c0_6 = arith.constant 0 : index
    %c0_7 = arith.constant 0 : index
    %4 = vector.load %arg3[%c0_5, %c0_6, %c0_7] : memref<16x2x256xf32, #tpu.memory_space<vmem>>, vector<16x2x256xf32>
    tpu.vector_store %arg3[%c0_5, %c0_6, %c0_7], %3 {strides = array<i32>} : memref<16x2x256xf32, #tpu.memory_space<vmem>>, vector<16x2x256xf32>,
    return
  }
  func.func @transform_0(%arg0: i32) -> (i32, i32, i32) {
    %c0_i32 = arith.constant 0 : i32
    %c0_i32_0 = arith.constant 0 : i32
    %c0_i32_1 = arith.constant 0 : i32
    return %arg0, %c0_i32, %c0_i32_0 : i32, i32, i32
  }
  func.func @transform_1(%arg0: i32) -> (i32, i32, i32) {
    %c0_i32 = arith.constant 0 : i32
    %c0_i32_0 = arith.constant 0 : i32
    %c0_i32_1 = arith.constant 0 : i32
    return %arg0, %c0_i32, %c0_i32_0 : i32, i32, i32
  }
  func.func @transform_2(%arg0: i32) -> (i32, i32, i32) {
    %c0_i32 = arith.constant 0 : i32
    %c0_i32_0 = arith.constant 0 : i32
    %c0_i32_1 = arith.constant 0 : i32
    return %arg0, %c0_i32, %c0_i32_0 : i32, i32, i32
  }
}

</mosaic_0001>

<bundles_post_ra>
// kernel: tpu_custom_call.1
= control target key start
LH: loop header
LB: loop body
LE: loop exit
PB: predicated region body
PF: predicated region fallthrough
CT: control target
= control target key end

     0   :  { %7 = vsyncpa [#allocation3], 0  ;;  %s845_s0 = inlined_call_operand.hbm [shape: f32[64,2,256], index: 0, kind: input, shape index: {}, may-alias: {0,2}]   ;;  %s846_s1 = inlined_call_operand.vmem [shape: f32[64,1,256], index: 1, kind: input, shape index: {}]   ;;  %s847_s2 = inlined_call_operand.hbm [shape: f32[64,2,256], index: 2, kind: output, shape index: {}, may-alias: {0,2}]  }
   0x1   :  { %9 = vsyncpa [#allocation3 + $0x1], 0 }
   0x2   :  { %10 = vsyncpa [#allocation4], 0 }
   0x3   :  { %12 = vsyncpa [#allocation4 + $0x1], 0  ;;  %s641_s9 = smov 0   ;;  %s643_s10 = smov 0  }
   0x4   :  { %s645_s11 = smov 0   ;;  %s647_s12 = smov 0  }
   0x5 LB: > { %s662_s13 = sadd.s32 4294967295, %s620_s12   ;;  %s452_s14 = sadd.s32 4294967294, %s620_s12   ;;  %s620_s12 = sphi %s647_s12, %s856_s12   ;;  %s616_s11 = sphi %s645_s11, %s855_s11   ;;  %s612_s10 = sphi %s643_s10, %s854_s10   ;;  %s608_s9 = sphi %s641_s9, %s853_s9  }
   0x6   : > { %s666_s15 = sadd.s32 1, %s620_s12   ;;  %s25_s16 = sadd.s32 1, %s616_s11 }
   0x7   : > { %s22_s17 = ssub.s32 %s620_s12, %s666_s15  ;;  %p32_p0 = scmp.ne.s32.totalorder %s616_s11, %s612_s10 }
   0x8   : > { %p23_p1 = scmp.eq.s32.totalorder %s22_s17, 0  ;;  %p33_p2 = scmp.eq.s32.totalorder %s620_s12, 0 }
   0x9   : > { %p38_p3 = scmp.ne.s32.totalorder %s612_s10, %s608_s9  ;;  %p39_p4 = scmp.eq.s32.totalorder %s662_s13, 0 }
   0xa   : > { %s678_s18 = scalar_select %p23_p1, %s616_s11, %s25_s16  }
   0xb   : > { %p680_p5 = por %p33_p2, %p32_p0  ;;  %p684_p6 = por %p39_p4, %p38_p3 }
   0xc   : > { %p88_p7 = scmp.eq.s32.totalorder %s662_s13, 3  ;;  %p94_p8 = scmp.eq.s32.totalorder %s452_s14, 3 }
   0xd   : > { %p486_p9 = scmp.lt.s32.totalorder %s620_s12, 4  ;;  %s114_s23 = sand.u32 1, %s616_s11  }
   0xe   : > { %p690_p10 = por %p88_p7, %p32_p0  ;;  %p694_p11 = por %p94_p8, %p38_p3 }
   0xf   : > { %s471_s24 = sshll.u32 %s620_s12, 6  ;;  %s455_s25 = sshll.u32 %s114_s23, 6 }
  0x10   : > { %s124_s28 = scalar_lea.hbm %s845_s0, %s471_s24  ;;  %s118_s30 = scalar_lea.vmem [#allocation2], %s455_s25 }
  0x11   : > { %s125_s29 = sshll.u32 %s124_s28, 4  ;;  %s127_s3 = sshll.u32 %s118_s30, 4  ;;  %s126_s29 = int_to_ptr.hbm [resolvable:$true] %s125_s29  ;;  %s128_s3 = int_to_ptr.vmem [resolvable:$true] %s127_s3 }
  0x12   : > { %p705_p12 = pnand %p486_p9, %p680_p5  ;;  %p459_p13 = scmp.ge.s32.totalorder %s620_s12, 1 }
  0x13   : > { %p144_p0 = scmp.lt.s32.totalorder %s620_s12, 5  ;;  %s115_s5 = scalar_lea.sflag [#allocation3], %s114_s23 }
  0x14   : > { %s524_s6 = sshra.s32 %s126_s29, 4  ;;  %p528_p2 = pneg %p705_p12  ;;  %s525_s6 = int_to_ptr.hbm [resolvable:$true] %s524_s6 }
  0x15   : > { %s526_s7 = scalar_lea.hbm %s525_s6, 64  ;;  %s531_s16 = scalar_lea.hbm %s845_s0, 256 }
  0x16   : > { %p527_p1 = scmp.ne.s32.totalorder %s525_s6, %s526_s7  ;;  %p532_p5 = scmp.lt.s32.totalorder %s525_s6, %s845_s0 }
  0x17   : > { %p533_p7 = scmp.lt.s32.totalorder %s531_s16, %s526_s7 }
  0x18   : > { %p529_p3 = pnand %p528_p2, %p527_p1 }
  0x19   : > { %p534_p8 = por %p533_p7, %p532_p5 }
  0x1a   : > { %p530_p4 = pneg %p529_p3 }
  0x1c   : > { %p535_p9 = pnand %p534_p8, %p530_p4 }
  0x1e   : > { %538 = shalt.err (!%p535_p9)
}
  0x1f   : > { %s622_s23 = smov 64   ;;  %s623_s24 = smov 4  }
  0x20   : > { %481 = dma.hbm_to_vmem [thread:$0]  (!%p705_p12), %s126_s29, 1024, %s128_s3, %s115_s5, %s622_s23, %s622_s23, %s623_s24  }
  0x21   : > { %p145_p1 = pnand %p459_p13, %p144_p0 }
  0x22   : > { %s726_s25 = sand.u32 (!%p145_p1), 1, %s612_s10  }
  0x23   : > { %148 = sbr.rel (%p145_p1) target bundleno = 77 (0x4d), region = 28  ;;  %s460_s26 = sshll.u32 (!%p145_p1), %s726_s25, 6 }
  0x24   : > { %s151_s27 = scalar_lea.sflag (!%p145_p1), [#allocation3], %s726_s25  ;;  %s732_s28 = scalar_lea.vmem (!%p145_p1), [#allocation2], %s460_s26 }
  0x28   : > { %599 = dma.done.wait (%p684_p6), %s151_s27, 1024  }
  0x29   : > { %601 = vsyncadd (%p684_p6), %s151_s27, 4294966272  ;;  %s462_s29 = sshll.u32 %s662_s13, 4  ;;  %vm285_vm0 = vcmask 1041408   ;;  %v189_v4 = vld [vmem:[%s732_s28] sm:$0xf]  ;;  %s761_s20 = scalar_lea.vmem [#allocation5], %s460_s26 }
  0x2a   : > { %p183_p12 = scmp.lt.s32.totalorder %s462_s29, 63  ;;  %v190_v12 = vld [vmem:[%s732_s28 + $0x4] sm:$0xf]  ;;  %v191_v17 = vld [vmem:[%s732_s28 + $0x8] sm:$0xf]  ;;  %s473_s6 = sshll.u32 %s662_s13, 6 }
  0x2b   : > { %v192_v22 = vld [vmem:[%s732_s28 + $0xc] sm:$0xf]  ;;  %v193_v27 = vld [vmem:[%s732_s28 + $0x10] sm:$0xf]  ;;  %v194_v33 = vld [vmem:[%s732_s28 + $0x14] sm:$0xf]  ;;  %s363_s8 = scalar_lea.hbm %s847_s2, %s473_s6 }
  0x2c   : > { %s858_s29 = smov (!%p183_p12, %s462_s29), 63  ;;  %v195_v39 = vld [vmem:[%s732_s28 + $0x18] sm:$0xf]  ;;  %v196_v50 = vld [vmem:[%s732_s28 + $0x1c] sm:$0xf]  ;;  %s364_s14 = sshll.u32 %s761_s20, 4  ;;  %s365_s14 = int_to_ptr.vmem [resolvable:$true] %s364_s14 }
  0x2d   : > { %s463_s30 = sshll.u32 %s858_s29, 1  ;;  %v197_v56 = vld [vmem:[%s732_s28 + $0x20] sm:$0xf]  ;;  %v198_v62 = vld [vmem:[%s732_s28 + $0x24] sm:$0xf]  ;;  %s366_s16 = sshll.u32 %s363_s8, 4  ;;  %s367_s16 = int_to_ptr.hbm [resolvable:$true] %s366_s16 }
  0x2e   : > { %s742_s5 = scalar_lea.vmem %s846_s1, %s463_s30  ;;  %s351_s17 = scalar_lea.sflag [#allocation4], %s726_s25 }
  0x2f   : > { %v205_v0 = vld [vmem:[%s742_s5] sm:$0x3]  ;;  %v206_v3 = vld [vmem:[%s742_s5 + $0x2] sm:$0x3]  ;;  %v207_v7 = vld [vmem:[%s742_s5 + $0x4] sm:$0x3] }
  0x30   : > { %v237_v1 = vperm.slane %v205_v0, 0  ;;  %v238_v2 = vperm.slane %v205_v0, 1  ;;  %v239_v5 = vperm.slane %v206_v3, 0  ;;  %v240_v6 = vperm.slane %v206_v3, 1  ;;  %v208_v11 = vld [vmem:[%s742_s5 + $0x6] sm:$0x3] }
  0x31   : > { %v241_v9 = vperm.slane %v207_v7, 0  ;;  %v242_v10 = vperm.slane %v207_v7, 1  ;;  %v243_v14 = vperm.slane %v208_v11, 0  ;;  %v244_v15 = vperm.slane %v208_v11, 1  ;;  %v209_v19 = vld [vmem:[%s742_s5 + $0x8] sm:$0x3] }
  0x32   : > { %v269_v8 = vrot.slane %v238_v2, 6  ;;  %v270_v13 = vrot.slane %v240_v6, 6  ;;  %v210_v24 = vld [vmem:[%s742_s5 + $0xa] sm:$0x3]  ;;  %v245_v28 = vperm.slane %v209_v19, 0  ;;  %v246_v29 = vperm.slane %v209_v19, 1 }
  0x33   : > { %v271_v18 = vrot.slane %v242_v10, 6  ;;  %v272_v23 = vrot.slane %v244_v15, 6  ;;  %v211_v30 = vld [vmem:[%s742_s5 + $0xc] sm:$0x3]  ;;  %v247_v34 = vperm.slane %v210_v24, 0  ;;  %v248_v35 = vperm.slane %v210_v24, 1 }
  0x34   : > { %v286_v16 = vsel %vm285_vm0, %v237_v1, %v269_v8  ;;  %v287_v21 = vsel %vm285_vm0, %v239_v5, %v270_v13  ;;  %v212_v36 = vld [vmem:[%s742_s5 + $0xe] sm:$0x3]  ;;  %v273_v38 = vrot.slane %v246_v29, 6  ;;  %v249_v40 = vperm.slane %v211_v30, 0  ;;  %v213_v47 = vld [vmem:[%s742_s5 + $0x10] sm:$0x3] }
  0x35   : > { %v318_v20 = vadd.f32 %v286_v16, %v189_v4  ;;  %v319_v25 = vadd.f32 %v287_v21, %v190_v12  ;;  %v288_v26 = vsel %vm285_vm0, %v241_v9, %v271_v18  ;;  %v289_v32 = vsel %vm285_vm0, %v243_v14, %v272_v23  ;;  %v214_v53 = vld [vmem:[%s742_s5 + $0x12] sm:$0x3]  ;;  %v215_v59 = vld [vmem:[%s742_s5 + $0x14] sm:$0x3]  ;;  %v216_v4 = vld [vmem:[%s742_s5 + $0x16] sm:$0x3] }
  0x36   : > { %v320_v31 = vadd.f32 %v288_v26, %v191_v17  ;;  %v321_v37 = vadd.f32 %v289_v32, %v192_v22  ;;  %v250_v41 = vperm.slane %v211_v30, 1  ;;  %v274_v42 = vrot.slane %v248_v35, 6  ;;  %v199_v9 = vld [vmem:[%s732_s28 + $0x28] sm:$0xf]  ;;  %v200_v13 = vld [vmem:[%s732_s28 + $0x2c] sm:$0xf] }
  0x37   : > { %334 = vst [vmem:[%s761_s20] sm:$0xf] %v318_v20  ;;  %v251_v43 = vperm.slane %v212_v36, 0  ;;  %v252_v44 = vperm.slane %v212_v36, 1  ;;  %v290_v45 = vsel %vm285_vm0, %v245_v28, %v273_v38  ;;  %v253_v52 = vperm.slane %v213_v47, 0  ;;  %v217_v15 = vld [vmem:[%s742_s5 + $0x18] sm:$0x3] }
  0x38   : > { %335 = vst [vmem:[%s761_s20 + $0x4] sm:$0xf] %v319_v25  ;;  %v275_v46 = vrot.slane %v250_v41, 6  ;;  %v322_v48 = vadd.f32 %v290_v45, %v193_v27  ;;  %v291_v49 = vsel %vm285_vm0, %v247_v34, %v274_v42  ;;  %v254_v57 = vperm.slane %v213_v47, 1  ;;  %v201_v18 = vld [vmem:[%s732_s28 + $0x30] sm:$0xf] }
  0x39   : > { %336 = vst [vmem:[%s761_s20 + $0x8] sm:$0xf] %v320_v31  ;;  %v276_v51 = vrot.slane %v252_v44, 6  ;;  %v323_v54 = vadd.f32 %v291_v49, %v194_v33  ;;  %v255_v58 = vperm.slane %v214_v53, 0  ;;  %v256_v63 = vperm.slane %v214_v53, 1  ;;  %s568_s19 = sshra.s32 %s367_s16, 4  ;;  %s569_s19 = int_to_ptr.hbm [resolvable:$true] %s568_s19 }
  0x3a   : > { %337 = vst [vmem:[%s761_s20 + $0xc] sm:$0xf] %v321_v37  ;;  %v292_v55 = vsel %vm285_vm0, %v249_v40, %v275_v46  ;;  %v257_v0 = vperm.slane %v215_v59, 0  ;;  %v277_v2 = vrot.slane %v254_v57, 6  ;;  %v258_v3 = vperm.slane %v215_v59, 1  ;;  %s570_s23 = scalar_lea.hbm %s569_s19, 64  ;;  %p575_p2 = scmp.lt.s32.totalorder %s569_s19, %s847_s2 }
  0x3b   : > { %338 = vst [vmem:[%s761_s20 + $0x10] sm:$0xf] %v322_v48  ;;  %v324_v60 = vadd.f32 %v292_v55, %v195_v39  ;;  %v293_v61 = vsel %vm285_vm0, %v251_v43, %v276_v51  ;;  %v278_v5 = vrot.slane %v256_v63, 6  ;;  %v259_v6 = vperm.slane %v216_v4, 0  ;;  %v218_v21 = vld [vmem:[%s742_s5 + $0x1a] sm:$0x3]  ;;  %p571_p6 = scmp.ne.s32.totalorder %s569_s19, %s570_s23 }
  0x3c   : > { %339 = vst [vmem:[%s761_s20 + $0x14] sm:$0xf] %v323_v54  ;;  %v325_v1 = vadd.f32 %v293_v61, %v196_v50  ;;  %v260_v7 = vperm.slane %v216_v4, 1  ;;  %v294_v8 = vsel %vm285_vm0, %v253_v52, %v277_v2  ;;  %v279_v10 = vrot.slane %v258_v3, 6  ;;  %v202_v24 = vld [vmem:[%s732_s28 + $0x34] sm:$0xf] }
  0x3d   : > { %340 = vst [vmem:[%s761_s20 + $0x18] sm:$0xf] %v324_v60  ;;  %v326_v11 = vadd.f32 %v294_v8, %v197_v56  ;;  %v295_v12 = vsel %vm285_vm0, %v255_v58, %v278_v5  ;;  %v261_v19 = vperm.slane %v217_v15, 0  ;;  %v262_v20 = vperm.slane %v217_v15, 1  ;;  %v219_v27 = vld [vmem:[%s742_s5 + $0x1c] sm:$0x3]  ;;  %p572_p13 = pnand %p571_p6, %p690_p10 }
  0x3e   : > { %341 = vst [vmem:[%s761_s20 + $0x1c] sm:$0xf] %v325_v1  ;;  %v280_v14 = vrot.slane %v260_v7, 6  ;;  %v327_v16 = vadd.f32 %v295_v12, %v198_v62  ;;  %v296_v17 = vsel %vm285_vm0, %v257_v0, %v279_v10  ;;  %v263_v25 = vperm.slane %v218_v21, 0  ;;  %v203_v33 = vld [vmem:[%s732_s28 + $0x38] sm:$0xf] }
  0x3f   : > { %342 = vst [vmem:[%s761_s20 + $0x20] sm:$0xf] %v326_v11  ;;  %v328_v22 = vadd.f32 %v296_v17, %v199_v9  ;;  %v264_v26 = vperm.slane %v218_v21, 1  ;;  %v281_v29 = vrot.slane %v262_v20, 6  ;;  %v265_v30 = vperm.slane %v219_v27, 0  ;;  %p573_p0 = pneg %p572_p13  ;;  %s574_s27 = scalar_lea.hbm %s847_s2, 256 }
  0x40   : > { %v297_v23 = vsel %vm285_vm0, %v259_v6, %v280_v14  ;;  %343 = vst [vmem:[%s761_s20 + $0x24] sm:$0xf] %v327_v16  ;;  %v266_v31 = vperm.slane %v219_v27, 1  ;;  %v220_v36 = vld [vmem:[%s742_s5 + $0x1e] sm:$0x3]  ;;  %p576_p3 = scmp.lt.s32.totalorder %s574_s27, %s570_s23 }
  0x41   : > { %v329_v28 = vadd.f32 %v297_v23, %v200_v13  ;;  %344 = vst [vmem:[%s761_s20 + $0x28] sm:$0xf] %v328_v22  ;;  %v282_v32 = vrot.slane %v264_v26, 6  ;;  %v298_v34 = vsel %vm285_vm0, %v261_v19, %v281_v29  ;;  %v267_v39 = vperm.slane %v220_v36, 0  ;;  %v204_v44 = vld [vmem:[%s732_s28 + $0x3c] sm:$0xf] }
  0x42   : > { %v283_v35 = vrot.slane %v266_v31, 6  ;;  %v330_v37 = vadd.f32 %v298_v34, %v201_v18  ;;  %v268_v40 = vperm.slane %v220_v36, 1  ;;  %p577_p4 = por %p576_p3, %p575_p2 }
  0x43   : > { %345 = vst [vmem:[%s761_s20 + $0x2c] sm:$0xf] %v329_v28  ;;  %v299_v38 = vsel %vm285_vm0, %v263_v25, %v282_v32 }
  0x44   : > { %v331_v41 = vadd.f32 %v299_v38, %v202_v24  ;;  %v300_v42 = vsel %vm285_vm0, %v265_v30, %v283_v35  ;;  %346 = vst [vmem:[%s761_s20 + $0x30] sm:$0xf] %v330_v37  ;;  %v284_v45 = vrot.slane %v268_v40, 6  ;;  %p578_p5 = pnand %p577_p4, %p573_p0 }
  0x45   : > { %v332_v43 = vadd.f32 %v300_v42, %v203_v33 }
  0x46   : > { %347 = vst [vmem:[%s761_s20 + $0x34] sm:$0xf] %v331_v41  ;;  %v301_v46 = vsel %vm285_vm0, %v267_v39, %v284_v45 }
  0x47   : > { %348 = vst [vmem:[%s761_s20 + $0x38] sm:$0xf] %v332_v43  ;;  %v333_v47 = vadd.f32 %v301_v46, %v204_v44 }
  0x49   : > { %349 = vst [vmem:[%s761_s20 + $0x3c] sm:$0xf] %v333_v47 }
  0x4a   : > { %581 = shalt.err (!%p578_p5)
}
  0x4b   : > { %s624_s25 = smov 64   ;;  %s625_s30 = smov 4  }
  0x4c   : > { %476 = dma.vmem_to_hbm [thread:$0]  (%p690_p10), %s365_s14, 1024, %s367_s16, %s351_s17, %s624_s25, %s624_s25, %s625_s30  }
  0x4d PF: > { %p487_p7 = scmp.ge.s32.totalorder %s620_s12, 2  ;;  %s381_s3 = sand.u32 1, %s608_s9  }
  0x4e   : > { %s382_s4 = scalar_lea.sflag [#allocation4], %s381_s3 }
  0x4f   : > { %p483_p8 = pnand %p487_p7, %p694_p11 }
  0x51   : > { %p484_p9 = pneg %p483_p8 }
  0x53   : > { %603 = dma.done.wait (%p484_p9), %s382_s4, 1024  }
  0x54   : > { %605 = vsyncadd (%p484_p9), %s382_s4, 4294966272  ;;  %p15_p1 = scmp.ge.s32.totalorder %s666_s15, 6   ;;  %s853_s9 = smov %s612_s10 }
  0x55   : > { %s854_s10 = smov %s616_s11  ;;  %s855_s11 = smov %s678_s18 }
  0x56   : > { %s856_s12 = smov %s666_s15  ;;  %17 = sbr.rel (!%p15_p1) target bundleno = 5 (0x5), region = 76 }
  0x5b   :  { %388 = vsyncpa [#allocation3], 1 }
  0x5c   :  { %390 = vsyncpa [#allocation3 + $0x1], 1 }
  0x5d   :  { %391 = vsyncpa [#allocation4], 1 }
  0x5e   :  { %393 = vsyncpa [#allocation4 + $0x1], 1 }

</bundles_post_ra>
